<compile_context>
chip_gen: v5e
topology: v5e:2x2
jax: 0.10.0
libtpu: 0.0.40
codegen_flags: <defaults>
</compile_context>

<pallas_src>
import jax
import jax.numpy as jnp
from jax.experimental import pallas as pl
from jax.experimental.pallas import tpu as pltpu

EPS = 1e-5          # nn.BatchNorm1d default eps
NEG_SLOPE = 0.01    # F.leaky_relu / nn.LeakyReLU default negative_slope
LANE = 128          # TPU lane width
SUBLANE = 8         # f32 sublane width


def _round_up(n, m):
    return ((n + m - 1) // m) * m


def _pad2d(a, rows, cols):
    r, c = a.shape
    return jnp.pad(a, ((0, rows - r), (0, cols - c)))


def _make_kernel(num_blocks):
    """Kernel for `num_blocks` fused (Linear+BN+LeakyReLU) blocks + fused heads."""

    def kernel(*refs):
        # refs = [x, (w, b) * num_blocks, w_head, b_head, out]
        idx = 0
        h = refs[idx][...]
        idx += 1
        for _ in range(num_blocks):
            w_ref, b_ref = refs[idx], refs[idx + 1]
            idx += 2
            # Linear with BatchNorm pre-folded into (w, b) by the wrapper.
            h = jnp.dot(h, w_ref[...], preferred_element_type=jnp.float32) + b_ref[...]
            # Dropout: identity in eval mode.
            # TODO(synk): training-mode dropout would need pltpu.prng_random_bits;
            #             the PyTorch RNG stream cannot be reproduced exactly anyway.
            # LeakyReLU
            h = jnp.where(h >= 0.0, h, NEG_SLOPE * h)

        w_head, b_head, out_ref = refs[idx], refs[idx + 1], refs[idx + 2]
        out_ref[...] = (jnp.dot(h, w_head[...], preferred_element_type=jnp.float32)
                        + b_head[...]).astype(out_ref.dtype)

    return kernel


def vae_interlayer_forward(x, params, *, tb=None):
    """Eval-mode VAEInterlayer forward in a single pallas_call, tiled over batch.

    Returns (z_mean, z_logvar), each of shape (B, output_features), float32.
    """
    B, F = x.shape
    blocks = params["blocks"]
    num_blocks = len(blocks)
    out_f = params["wm"].shape[1]

    # ---- Fold BatchNorm (eval, running stats) into each Linear. ----
    folded = []
    for blk in blocks:
        scale = blk["gamma"] * jax.lax.rsqrt(blk["var"] + EPS)      # (1, fout)
        w_f = blk["w"] * scale                                      # (fin, fout)
        b_f = (blk["b"] - blk["mean"]) * scale + blk["beta"]        # (1, fout)
        folded.append((w_f, b_f))

    # ---- Fuse the two heads into one lane-denser matmul / output. ----
    w_head = jnp.concatenate([params["wm"], params["wl"]], axis=1)  # (flast, 2*out_f)
    b_head = jnp.concatenate([params["bm"], params["bl"]], axis=1)  # (1, 2*out_f)

    # ---- Zero-pad every feature dim up to a multiple of 128 lanes. ----
    feats = [F] + [w.shape[1] for (w, _) in folded]
    feats_p = [_round_up(v, LANE) for v in feats]
    out2 = 2 * out_f
    out2_p = _round_up(out2, LANE)

    flat = []
    for li, (w_f, b_f) in enumerate(folded):
        flat.append(_pad2d(w_f, feats_p[li], feats_p[li + 1]))
        flat.append(_pad2d(b_f, 1, feats_p[li + 1]))
    flat.append(_pad2d(w_head, feats_p[-1], out2_p))
    flat.append(_pad2d(b_head, 1, out2_p))

    # ---- Batch tiling: big tiles, padded batch, parallel grid axis. ----
    if tb is None:
        tb = min(_round_up(B, SUBLANE), 256)
    tb = _round_up(tb, SUBLANE)
    Bp = _round_up(B, tb)
    x_p = _pad2d(x.astype(jnp.float32), Bp, feats_p[0])
    grid = (Bp // tb,)

    in_specs = [pl.BlockSpec((tb, feats_p[0]), lambda i: (i, 0))]
    for a in flat:
        # Grid-invariant parameters: full-array blocks, same block every step.
        in_specs.append(pl.BlockSpec(a.shape, lambda i: (0, 0)))

    out_specs = pl.BlockSpec((tb, out2_p), lambda i: (i, 0))
    out_shape = jax.ShapeDtypeStruct((Bp, out2_p), jnp.float32)

    out = pl.pallas_call(
        _make_kernel(num_blocks),
        grid=grid,
        in_specs=in_specs,
        out_specs=out_specs,
        out_shape=out_shape,
        compiler_params=pltpu.CompilerParams(dimension_semantics=("parallel",)),
    )(x_p, *flat)

    z = out[:B, :out2]
    return z[:, :out_f], z[:, out_f:]


# ---------------------------------------------------------------------------
# Deterministic parameter construction (mirrors the nn.Module's shapes).
# ---------------------------------------------------------------------------
def make_params(key, input_features, middle_layers_features, output_features,
                dtype=jnp.float32):
    feats = [input_features] + list(middle_layers_features)
    blocks = []
    for li in range(len(middle_layers_features)):
        fin, fout = feats[li], feats[li + 1]
        key, kw, kb, kg, kbe, km, kv = jax.random.split(key, 7)
        blocks.append(dict(
            # Linear weight stored already transposed: (in, out)
            w=(jax.random.normal(kw, (fin, fout), dtype) * (2.0 / fin) ** 0.5),
            b=jax.random.normal(kb, (1, fout), dtype) * 0.01,
            gamma=1.0 + 0.1 * jax.random.normal(kg, (1, fout), dtype),
            beta=0.1 * jax.random.normal(kbe, (1, fout), dtype),
            mean=0.1 * jax.random.normal(km, (1, fout), dtype),
            var=1.0 + 0.1 * jax.random.uniform(kv, (1, fout), dtype),
        ))
    flast = middle_layers_features[-1]
    key, kwm, kbm, kwl, kbl = jax.random.split(key, 5)
    return dict(
        blocks=blocks,
        wm=jax.random.normal(kwm, (flast, output_features), dtype) * (1.0 / flast) ** 0.5,
        bm=jax.random.normal(kbm, (1, output_features), dtype) * 0.01,
        wl=jax.random.normal(kwl, (flast, output_features), dtype) * (1.0 / flast) ** 0.5,
        bl=jax.random.normal(kbl, (1, output_features), dtype) * 0.01,
    )


def reference_forward(x, params):
    """Pure-JAX reference (eval-mode semantics, unfused) for correctness check."""
    h = x
    for blk in params["blocks"]:
        h = h @ blk["w"] + blk["b"]
        h = (h - blk["mean"]) * (blk["gamma"] / jnp.sqrt(blk["var"] + EPS)) + blk["beta"]
        h = jnp.where(h >= 0.0, h, NEG_SLOPE * h)
    z_mean = h @ params["wm"] + params["bm"]
    z_logvar = h @ params["wl"] + params["bl"]
    return z_mean, z_logvar


if __name__ == "__main__":
    key = jax.random.PRNGKey(0)
    key, kx, kp = jax.random.split(key, 3)

    batch = 16
    input_features = 16
    middle_layers_features = [32, 32]
    output_features = 8

    x = jax.random.normal(kx, (batch, input_features), jnp.float32)
    params = make_params(kp, input_features, middle_layers_features, output_features)

    z_mean, z_logvar = vae_interlayer_forward(x, params)
    jax.block_until_ready((z_mean, z_logvar))

    ref_mean, ref_logvar = reference_forward(x, params)
    assert z_mean.shape == ref_mean.shape and z_logvar.shape == ref_logvar.shape
    assert jnp.allclose(z_mean, ref_mean, atol=1e-4, rtol=1e-4)
    assert jnp.allclose(z_logvar, ref_logvar, atol=1e-4, rtol=1e-4)

    print("KERNEL_OK")
</pallas_src>

<mosaic_0001>
module attributes {stable_mosaic.version = 11 : i64} {
  func.func @kernel(%arg0: i32, %arg1: memref<16x128xf32, #tpu.memory_space<vmem>>, %arg2: memref<128x128xf32, #tpu.memory_space<vmem>>, %arg3: memref<1x128xf32, #tpu.memory_space<vmem>>, %arg4: memref<128x128xf32, #tpu.memory_space<vmem>>, %arg5: memref<1x128xf32, #tpu.memory_space<vmem>>, %arg6: memref<128x128xf32, #tpu.memory_space<vmem>>, %arg7: memref<1x128xf32, #tpu.memory_space<vmem>>, %arg8: memref<16x128xf32, #tpu.memory_space<vmem>>) attributes {dimension_semantics = [#tpu.dimension_semantics<parallel>], iteration_bounds = array<i64: 1>, scalar_prefetch = 0 : i64, scratch_operands = 0 : i64, tpu.core_type = #tpu.core_type<tc>, window_params = [{transform_indices = @transform_0, window_bounds = array<i64: 16, 128>}, {pipeline_mode = #tpu.pipeline_mode<synchronous>, transform_indices = @transform_1, window_bounds = array<i64: 128, 128>}, {pipeline_mode = #tpu.pipeline_mode<synchronous>, transform_indices = @transform_2, window_bounds = array<i64: 1, 128>}, {pipeline_mode = #tpu.pipeline_mode<synchronous>, transform_indices = @transform_3, window_bounds = array<i64: 128, 128>}, {pipeline_mode = #tpu.pipeline_mode<synchronous>, transform_indices = @transform_4, window_bounds = array<i64: 1, 128>}, {pipeline_mode = #tpu.pipeline_mode<synchronous>, transform_indices = @transform_5, window_bounds = array<i64: 128, 128>}, {pipeline_mode = #tpu.pipeline_mode<synchronous>, transform_indices = @transform_6, window_bounds = array<i64: 1, 128>}, {transform_indices = @transform_7, window_bounds = array<i64: 16, 128>}]} {
    %c0 = arith.constant 0 : index
    %c0_0 = arith.constant 0 : index
    %0 = vector.load %arg1[%c0, %c0_0] : memref<16x128xf32, #tpu.memory_space<vmem>>, vector<16x128xf32>
    %c0_1 = arith.constant 0 : index
    %c0_2 = arith.constant 0 : index
    %1 = vector.load %arg2[%c0_1, %c0_2] : memref<128x128xf32, #tpu.memory_space<vmem>>, vector<128x128xf32>
    %cst = arith.constant dense<0.000000e+00> : vector<16x128xf32>
    %2 = tpu.matmul %0, %1, %cst {dimension_numbers = #tpu.dot_dimension_numbers<[1], [0], [0], [1], [0, 0, 1, 1], [], []>} : vector<16x128xf32>, vector<128x128xf32>, vector<16x128xf32> -> vector<16x128xf32>
    %c0_3 = arith.constant 0 : index
    %c0_4 = arith.constant 0 : index
    %3 = vector.load %arg3[%c0_3, %c0_4] : memref<1x128xf32, #tpu.memory_space<vmem>>, vector<1x128xf32>
    %4 = vector.broadcast %3 : vector<1x128xf32> to vector<16x128xf32>
    %5 = arith.addf %2, %4 : vector<16x128xf32>
    %cst_5 = arith.constant 0.000000e+00 : f32
    %6 = vector.broadcast %cst_5 : f32 to vector<16x128xf32>
    %7 = arith.cmpf oge, %5, %6 : vector<16x128xf32>
    %cst_6 = arith.constant 0.00999999977 : f32
    %8 = vector.broadcast %cst_6 : f32 to vector<16x128xf32>
    %9 = arith.mulf %8, %5 : vector<16x128xf32>
    %10 = arith.select %7, %5, %9 : vector<16x128xi1>, vector<16x128xf32>
    %c0_7 = arith.constant 0 : index
    %c0_8 = arith.constant 0 : index
    %11 = vector.load %arg4[%c0_7, %c0_8] : memref<128x128xf32, #tpu.memory_space<vmem>>, vector<128x128xf32>
    %cst_9 = arith.constant dense<0.000000e+00> : vector<16x128xf32>
    %12 = tpu.matmul %10, %11, %cst_9 {dimension_numbers = #tpu.dot_dimension_numbers<[1], [0], [0], [1], [0, 0, 1, 1], [], []>} : vector<16x128xf32>, vector<128x128xf32>, vector<16x128xf32> -> vector<16x128xf32>
    %c0_10 = arith.constant 0 : index
    %c0_11 = arith.constant 0 : index
    %13 = vector.load %arg5[%c0_10, %c0_11] : memref<1x128xf32, #tpu.memory_space<vmem>>, vector<1x128xf32>
    %14 = vector.broadcast %13 : vector<1x128xf32> to vector<16x128xf32>
    %15 = arith.addf %12, %14 : vector<16x128xf32>
    %cst_12 = arith.constant 0.000000e+00 : f32
    %16 = vector.broadcast %cst_12 : f32 to vector<16x128xf32>
    %17 = arith.cmpf oge, %15, %16 : vector<16x128xf32>
    %cst_13 = arith.constant 0.00999999977 : f32
    %18 = vector.broadcast %cst_13 : f32 to vector<16x128xf32>
    %19 = arith.mulf %18, %15 : vector<16x128xf32>
    %20 = arith.select %17, %15, %19 : vector<16x128xi1>, vector<16x128xf32>
    %c0_14 = arith.constant 0 : index
    %c0_15 = arith.constant 0 : index
    %21 = vector.load %arg6[%c0_14, %c0_15] : memref<128x128xf32, #tpu.memory_space<vmem>>, vector<128x128xf32>
    %cst_16 = arith.constant dense<0.000000e+00> : vector<16x128xf32>
    %22 = tpu.matmul %20, %21, %cst_16 {dimension_numbers = #tpu.dot_dimension_numbers<[1], [0], [0], [1], [0, 0, 1, 1], [], []>} : vector<16x128xf32>, vector<128x128xf32>, vector<16x128xf32> -> vector<16x128xf32>
    %c0_17 = arith.constant 0 : index
    %c0_18 = arith.constant 0 : index
    %23 = vector.load %arg7[%c0_17, %c0_18] : memref<1x128xf32, #tpu.memory_space<vmem>>, vector<1x128xf32>
    %24 = vector.broadcast %23 : vector<1x128xf32> to vector<16x128xf32>
    %25 = arith.addf %22, %24 : vector<16x128xf32>
    %c0_19 = arith.constant 0 : index
    %c0_20 = arith.constant 0 : index
    %26 = vector.load %arg8[%c0_19, %c0_20] : memref<16x128xf32, #tpu.memory_space<vmem>>, vector<16x128xf32>
    tpu.vector_store %arg8[%c0_19, %c0_20], %25 {strides = array<i32>} : memref<16x128xf32, #tpu.memory_space<vmem>>, vector<16x128xf32>,
    return
  }
  func.func @transform_0(%arg0: i32) -> (i32, i32) {
    %c0_i32 = arith.constant 0 : i32
    %c0_i32_0 = arith.constant 0 : i32
    return %arg0, %c0_i32 : i32, i32
  }
  func.func @transform_1(%arg0: i32) -> (i32, i32) {
    %c0_i32 = arith.constant 0 : i32
    %c0_i32_0 = arith.constant 0 : i32
    %c0_i32_1 = arith.constant 0 : i32
    return %c0_i32, %c0_i32_0 : i32, i32
  }
  func.func @transform_2(%arg0: i32) -> (i32, i32) {
    %c0_i32 = arith.constant 0 : i32
    %c0_i32_0 = arith.constant 0 : i32
    %c0_i32_1 = arith.constant 0 : i32
    return %c0_i32, %c0_i32_0 : i32, i32
  }
  func.func @transform_3(%arg0: i32) -> (i32, i32) {
    %c0_i32 = arith.constant 0 : i32
    %c0_i32_0 = arith.constant 0 : i32
    %c0_i32_1 = arith.constant 0 : i32
    return %c0_i32, %c0_i32_0 : i32, i32
  }
  func.func @transform_4(%arg0: i32) -> (i32, i32) {
    %c0_i32 = arith.constant 0 : i32
    %c0_i32_0 = arith.constant 0 : i32
    %c0_i32_1 = arith.constant 0 : i32
    return %c0_i32, %c0_i32_0 : i32, i32
  }
  func.func @transform_5(%arg0: i32) -> (i32, i32) {
    %c0_i32 = arith.constant 0 : i32
    %c0_i32_0 = arith.constant 0 : i32
    %c0_i32_1 = arith.constant 0 : i32
    return %c0_i32, %c0_i32_0 : i32, i32
  }
  func.func @transform_6(%arg0: i32) -> (i32, i32) {
    %c0_i32 = arith.constant 0 : i32
    %c0_i32_0 = arith.constant 0 : i32
    %c0_i32_1 = arith.constant 0 : i32
    return %c0_i32, %c0_i32_0 : i32, i32
  }
  func.func @transform_7(%arg0: i32) -> (i32, i32) {
    %c0_i32 = arith.constant 0 : i32
    %c0_i32_0 = arith.constant 0 : i32
    return %arg0, %c0_i32 : i32, i32
  }
}

</mosaic_0001>

<bundles_post_ra>
// kernel: tpu_custom_call.1
= control target key start
LH: loop header
LB: loop body
LE: loop exit
PB: predicated region body
PF: predicated region fallthrough
CT: control target
= control target key end

     0   :  { %12 = vsyncpa [#allocation3], 0  ;;  %s496_s0 = inlined_call_operand.hbm [shape: f32[16,128], index: 0, kind: input, shape index: {}]   ;;  %s497_s1 = inlined_call_operand.hbm [shape: f32[128,128], index: 1, kind: input, shape index: {}]   ;;  %s498_s2 = inlined_call_operand.vmem [shape: f32[1,128], index: 2, kind: input, shape index: {}]   ;;  %s499_s3 = inlined_call_operand.hbm [shape: f32[128,128], index: 3, kind: input, shape index: {}]   ;;  %s500_s4 = inlined_call_operand.vmem [shape: f32[1,128], index: 4, kind: input, shape index: {}]   ;;  %s501_s5 = inlined_call_operand.hbm [shape: f32[128,128], index: 5, kind: input, shape index: {}]   ;;  %s502_s6 = inlined_call_operand.vmem [shape: f32[1,128], index: 6, kind: input, shape index: {}]   ;;  %s503_s7 = inlined_call_operand.hbm [shape: f32[16,128], index: 7, kind: output, shape index: {}]  }
   0x1   :  { %13 = vsyncpa [#allocation6], 0 }
   0x2   :  { %14 = vsyncpa [#allocation9], 0 }
   0x3   :  { %15 = vsyncpa [#allocation4], 0  ;;  %s33_s26 = sshll.u32 %s497_s1, 4  ;;  %s410_s27 = smov [#allocation5]   ;;  %s34_s26 = int_to_ptr.hbm [resolvable:$true] %s33_s26 }
   0x4   :  { %s35_s28 = sshll.u32 %s410_s27, 4  ;;  %s20_s8 = sshll.u32 %s496_s0, 4  ;;  %s36_s28 = int_to_ptr.vmem [resolvable:$true] %s35_s28  ;;  %s21_s8 = int_to_ptr.hbm [resolvable:$true] %s20_s8 }
   0x5   :  { %s411_s9 = smov 128   ;;  %s412_s10 = smov 8  }
   0x6   :  { %41 = dma.hbm_to_vmem [thread:$0]  %s34_s26, 2048, %s36_s28, [#allocation6], %s411_s9, %s411_s9, %s412_s10  }
   0x7   :  { %s413_s11 = smov [#allocation2]   ;;  %s48_s1 = sshll.u32 %s499_s3, 4  ;;  %s49_s1 = int_to_ptr.hbm [resolvable:$true] %s48_s1 }
   0x8   :  { %s22_s12 = sshll.u32 %s413_s11, 4  ;;  %s63_s16 = sshll.u32 %s501_s5, 4  ;;  %s23_s12 = int_to_ptr.vmem [resolvable:$true] %s22_s12  ;;  %s64_s16 = int_to_ptr.hbm [resolvable:$true] %s63_s16 }
   0x9   :  { %28 = dma.hbm_to_vmem [thread:$0]  %s21_s8, 256, %s23_s12, [#allocation3], %s411_s9, %s411_s9, %s412_s10  }
   0xa   :  { %s414_s17 = smov [#allocation7]   ;;  %s415_s19 = smov [#allocation8]  }
   0xb   :  { %s50_s18 = sshll.u32 %s414_s17, 4  ;;  %s65_s3 = sshll.u32 %s415_s19, 4  ;;  %s51_s18 = int_to_ptr.vmem [resolvable:$true] %s50_s18  ;;  %s66_s3 = int_to_ptr.vmem [resolvable:$true] %s65_s3 }
   0xc   :  { %56 = dma.hbm_to_vmem [thread:$0]  %s49_s1, 2048, %s51_s18, [#allocation6], %s411_s9, %s411_s9, %s412_s10  }
   0xd   :  { %71 = dma.hbm_to_vmem [thread:$0]  %s64_s16, 2048, %s66_s3, [#allocation9], %s411_s9, %s411_s9, %s412_s10  }
   0xe   :  { %402 = dma.done.wait [#allocation3], 256  }
   0xf   :  { %403 = vsyncadd [#allocation3], 4294967040 }
  0x10   :  { %404 = dma.done.wait [#allocation6], 4096  }
  0x11   :  { %405 = vsyncadd [#allocation6], 4294963200 }
  0x12   :  { %406 = dma.done.wait [#allocation9], 2048  }
  0x13   :  { %407 = vsyncadd [#allocation9], 4294965248  ;;  %v107_v0 = vld [vmem:[#allocation5 + $0x78] sm:$0xff]  ;;  %v106_v1 = vld [vmem:[#allocation5 + $0x70] sm:$0xff]  ;;  %s241_s27 = sshll.u32 %s503_s7, 4  ;;  %s242_s27 = int_to_ptr.hbm [resolvable:$true] %s241_s27 }
  0x14   :  { %112 = vmatpush.msra.mxu0 %v107_v0  ;;  %256 = vmatpush.msra.mxu3 %v107_v0  ;;  %v105_v2 = vld [vmem:[#allocation5 + $0x68] sm:$0xff]  ;;  %v104_v3 = vld [vmem:[#allocation5 + $0x60] sm:$0xff]  ;;  %v103_v4 = vld [vmem:[#allocation5 + $0x58] sm:$0xff] }
  0x15   :  { %v156_v5 = vld [vmem:[#allocation7 + $0x78] sm:$0xff]  ;;  %v155_v6 = vld [vmem:[#allocation7 + $0x70] sm:$0xff]  ;;  %v154_v8 = vld [vmem:[#allocation7 + $0x68] sm:$0xff] }
  0x16   :  { %113 = vmatpush.msra.mxu0 %v106_v1  ;;  %257 = vmatpush.msra.mxu3 %v106_v1  ;;  %v102_v7 = vld [vmem:[#allocation5 + $0x50] sm:$0xff]  ;;  %v101_v9 = vld [vmem:[#allocation5 + $0x48] sm:$0xff]  ;;  %v153_v10 = vld [vmem:[#allocation7 + $0x60] sm:$0xff] }
  0x17   :  { %161 = vmatpush.msra.mxu1 %v156_v5  ;;  %v100_v11 = vld [vmem:[#allocation5 + $0x40] sm:$0xff]  ;;  %v152_v12 = vld [vmem:[#allocation7 + $0x58] sm:$0xff]  ;;  %v151_v14 = vld [vmem:[#allocation7 + $0x50] sm:$0xff] }
  0x18   :  { %114 = vmatpush.msra.mxu0 %v105_v2  ;;  %258 = vmatpush.msra.mxu3 %v105_v2  ;;  %v99_v13 = vld [vmem:[#allocation5 + $0x38] sm:$0xff]  ;;  %v98_v15 = vld [vmem:[#allocation5 + $0x30] sm:$0xff]  ;;  %v150_v16 = vld [vmem:[#allocation7 + $0x48] sm:$0xff] }
  0x19   :  { %162 = vmatpush.msra.mxu1 %v155_v6  ;;  %v97_v17 = vld [vmem:[#allocation5 + $0x28] sm:$0xff]  ;;  %v149_v18 = vld [vmem:[#allocation7 + $0x40] sm:$0xff]  ;;  %v148_v20 = vld [vmem:[#allocation7 + $0x38] sm:$0xff] }
  0x1a   :  { %115 = vmatpush.msra.mxu0 %v104_v3  ;;  %259 = vmatpush.msra.mxu3 %v104_v3  ;;  %v96_v19 = vld [vmem:[#allocation5 + $0x20] sm:$0xff]  ;;  %v95_v21 = vld [vmem:[#allocation5 + $0x18] sm:$0xff]  ;;  %v147_v22 = vld [vmem:[#allocation7 + $0x30] sm:$0xff] }
  0x1b   :  { %163 = vmatpush.msra.mxu1 %v154_v8  ;;  %v94_v23 = vld [vmem:[#allocation5 + $0x10] sm:$0xff]  ;;  %v146_v24 = vld [vmem:[#allocation7 + $0x28] sm:$0xff]  ;;  %v145_v26 = vld [vmem:[#allocation7 + $0x20] sm:$0xff] }
  0x1c   :  { %116 = vmatpush.msra.mxu0 %v103_v4  ;;  %260 = vmatpush.msra.mxu3 %v103_v4  ;;  %v93_v25 = vld [vmem:[#allocation5 + $0x8] sm:$0xff]  ;;  %v92_v27 = vld [vmem:[#allocation5] sm:$0xff]  ;;  %v90_v28 = vld [vmem:[#allocation2] sm:$0xff] }
  0x1d   :  { %164 = vmatpush.msra.mxu1 %v153_v10  ;;  %v91_v29 = vld [vmem:[#allocation2 + $0x8] sm:$0xff]  ;;  %v143_v31 = vld [vmem:[#allocation7 + $0x10] sm:$0xff]  ;;  %v142_v32 = vld [vmem:[#allocation7 + $0x8] sm:$0xff] }
  0x1e   :  { %117 = vmatpush.msra.mxu0 %v102_v7  ;;  %261 = vmatpush.msra.mxu3 %v102_v7  ;;  %v144_v30 = vld [vmem:[#allocation7 + $0x18] sm:$0xff]  ;;  %v141_v33 = vld [vmem:[#allocation7] sm:$0xff]  ;;  %v204_v35 = vld [vmem:[#allocation8 + $0x70] sm:$0xff] }
  0x1f   :  { %165 = vmatpush.msra.mxu1 %v152_v12  ;;  %v205_v34 = vld [vmem:[#allocation8 + $0x78] sm:$0xff]  ;;  %v203_v36 = vld [vmem:[#allocation8 + $0x68] sm:$0xff]  ;;  %v202_v37 = vld [vmem:[#allocation8 + $0x60] sm:$0xff] }
  0x20   :  { %118 = vmatpush.msra.mxu0 %v101_v9  ;;  %262 = vmatpush.msra.mxu3 %v101_v9  ;;  %v201_v38 = vld [vmem:[#allocation8 + $0x58] sm:$0xff]  ;;  %v200_v39 = vld [vmem:[#allocation8 + $0x50] sm:$0xff]  ;;  %v199_v40 = vld [vmem:[#allocation8 + $0x48] sm:$0xff] }
  0x21   :  { %166 = vmatpush.msra.mxu1 %v151_v14  ;;  %210 = vmatpush.msra.mxu2 %v205_v34  ;;  %v198_v41 = vld [vmem:[#allocation8 + $0x40] sm:$0xff]  ;;  %v197_v42 = vld [vmem:[#allocation8 + $0x38] sm:$0xff]  ;;  %v279_v43 = vld [vmem:[%s498_s2] ss:$0 sm:$0xff] }
  0x22   :  { %119 = vmatpush.msra.mxu0 %v100_v11  ;;  %263 = vmatpush.msra.mxu3 %v100_v11  ;;  %v196_v44 = vld [vmem:[#allocation8 + $0x30] sm:$0xff]  ;;  %v195_v46 = vld [vmem:[#allocation8 + $0x28] sm:$0xff]  ;;  %v194_v48 = vld [vmem:[#allocation8 + $0x20] sm:$0xff] }
  0x23   :  { %167 = vmatpush.msra.mxu1 %v150_v16  ;;  %211 = vmatpush.msra.mxu2 %v204_v35  ;;  %v193_v50 = vld [vmem:[#allocation8 + $0x18] sm:$0xff]  ;;  %v192_v56 = vld [vmem:[#allocation8 + $0x10] sm:$0xff]  ;;  %v191_v57 = vld [vmem:[#allocation8 + $0x8] sm:$0xff] }
  0x24   :  { %120 = vmatpush.msra.mxu0 %v99_v13  ;;  %264 = vmatpush.msra.mxu3 %v99_v13  ;;  %v190_v58 = vld [vmem:[#allocation8] sm:$0xff]  ;;  %v280_v59 = vld [vmem:[%s500_s4] ss:$0 sm:$0xff]  ;;  %s416_s4 = smov [#allocation10]  }
  0x25   :  { %168 = vmatpush.msra.mxu1 %v149_v18  ;;  %212 = vmatpush.msra.mxu2 %v203_v36  ;;  %v281_v4 = vld [vmem:[%s502_s6] ss:$0 sm:$0xff]  ;;  %s239_s24 = sshll.u32 %s416_s4, 4  ;;  %s240_s24 = int_to_ptr.vmem [resolvable:$true] %s239_s24 }
  0x26   :  { %121 = vmatpush.msra.mxu0 %v98_v15  ;;  %265 = vmatpush.msra.mxu3 %v98_v15 }
  0x27   :  { %169 = vmatpush.msra.mxu1 %v148_v20  ;;  %213 = vmatpush.msra.mxu2 %v202_v37 }
  0x28   :  { %122 = vmatpush.msra.mxu0 %v97_v17  ;;  %266 = vmatpush.msra.mxu3 %v97_v17 }
  0x29   :  { %170 = vmatpush.msra.mxu1 %v147_v22  ;;  %214 = vmatpush.msra.mxu2 %v201_v38 }
  0x2a   :  { %123 = vmatpush.msra.mxu0 %v96_v19  ;;  %267 = vmatpush.msra.mxu3 %v96_v19 }
  0x2b   :  { %171 = vmatpush.msra.mxu1 %v146_v24  ;;  %215 = vmatpush.msra.mxu2 %v200_v39 }
  0x2c   :  { %124 = vmatpush.msra.mxu0 %v95_v21  ;;  %268 = vmatpush.msra.mxu3 %v95_v21 }
  0x2d   :  { %172 = vmatpush.msra.mxu1 %v145_v26  ;;  %216 = vmatpush.msra.mxu2 %v199_v40 }
  0x2e   :  { %125 = vmatpush.msra.mxu0 %v94_v23  ;;  %269 = vmatpush.msra.mxu3 %v94_v23 }
  0x2f   :  { %173 = vmatpush.msra.mxu1 %v144_v30  ;;  %217 = vmatpush.msra.mxu2 %v198_v41 }
  0x30   :  { %126 = vmatpush.msra.mxu0 %v93_v25  ;;  %270 = vmatpush.msra.mxu3 %v93_v25 }
  0x31   :  { %174 = vmatpush.msra.mxu1 %v143_v31  ;;  %218 = vmatpush.msra.mxu2 %v197_v42 }
  0x32   :  { %127 = vmatpush.msra.mxu0 %v92_v27  ;;  %271 = vmatpush.msra.mxu3 %v92_v27 }
  0x33   :  { %128 = vmatmul.f32.vlgmr.msra.gmra.mxu0 %v90_v28  ;;  %131 = vmatmul.f32.vlgmr.msra.gmra.mxu3 %v91_v29 }
  0x34   :  { %175 = vmatpush.msra.mxu1 %v142_v32  ;;  %219 = vmatpush.msra.mxu2 %v196_v44 }
  0x36   :  { %176 = vmatpush.msra.mxu1 %v141_v33  ;;  %220 = vmatpush.msra.mxu2 %v195_v46 }
  0x38   :  { %221 = vmatpush.msra.mxu2 %v194_v48 }
  0x3a   :  { %222 = vmatpush.msra.mxu2 %v193_v50 }
  0x3c   :  { %223 = vmatpush.msra.mxu2 %v192_v56 }
  0x3e   :  { %224 = vmatpush.msra.mxu2 %v191_v57 }
  0x40   :  { %225 = vmatpush.msra.mxu2 %v190_v58 }
  0xb0   :  { %v129_v45 = vpop.f32.mrf.mxu0 }
  0xb1   :  { %v130_v47 = vadd.f32 %v279_v43, %v129_v45 }
  0xb3   :  { %vm135_vm0 = vcmp.ge.f32.partialorder %v130_v47, 0.0  ;;  %v137_v49 = vmul.f32 0.01, %v130_v47 }
  0xb5   :  { %v139_v51 = vsel %vm135_vm0, %v130_v47, %v137_v49 }
  0xb6   :  { %v132_v52 = vpop.f32.mrf.mxu3  ;;  %177 = vmatmul.f32.vlgmr.msra.gmra.mxu1 %v139_v51 }
  0xb7   :  { %v133_v53 = vadd.f32 %v279_v43, %v132_v52 }
  0xb9   :  { %v138_v54 = vmul.f32 0.01, %v133_v53  ;;  %vm136_vm1 = vcmp.ge.f32.partialorder %v133_v53, 0.0 }
  0xbb   :  { %v140_v55 = vsel %vm136_vm1, %v133_v53, %v138_v54 }
  0xbe   :  { %180 = vmatmul.f32.gmra.mxu1 %v140_v55 }
 0x133   :  { %v178_v60 = vpop.f32.mrf.mxu1 }
 0x134   :  { %v179_v61 = vadd.f32 %v280_v59, %v178_v60 }
 0x136   :  { %vm184_vm2 = vcmp.ge.f32.partialorder %v179_v61, 0.0  ;;  %v186_v62 = vmul.f32 0.01, %v179_v61 }
 0x138   :  { %v188_v63 = vsel %vm184_vm2, %v179_v61, %v186_v62 }
 0x139   :  { %226 = vmatmul.f32.vlgmr.msra.gmra.mxu2 %v188_v63 }
 0x13b   :  { %v181_v0 = vpop.f32.mrf.mxu1 }
 0x13c   :  { %v182_v1 = vadd.f32 %v280_v59, %v181_v0 }
 0x13e   :  { %vm185_vm3 = vcmp.ge.f32.partialorder %v182_v1, 0.0  ;;  %v187_v2 = vmul.f32 0.01, %v182_v1 }
 0x140   :  { %v189_v3 = vsel %vm185_vm3, %v182_v1, %v187_v2 }
 0x141   :  { %229 = vmatmul.f32.gmra.mxu2 %v189_v3 }
 0x1bc   :  { %v227_v5 = vpop.f32.mrf.mxu2 }
 0x1bd   :  { %v228_v6 = vadd.f32 %v281_v4, %v227_v5 }
 0x1bf   :  { %233 = vst [vmem:[#allocation10] sm:$0xff] %v228_v6 }
 0x1c4   :  { %v230_v7 = vpop.f32.mrf.mxu2 }
 0x1c5   :  { %v231_v8 = vadd.f32 %v281_v4, %v230_v7 }
 0x1c7   :  { %234 = vst [vmem:[#allocation10 + $0x8] sm:$0xff] %v231_v8 }
 0x1c8   :  { %247 = dma.vmem_to_hbm [thread:$0]  %s240_s24, 256, %s242_s27, [#allocation4], %s411_s9, %s411_s9, %s412_s10  }
 0x1c9   :  { %408 = dma.done.wait [#allocation4], 256  }
 0x1ca   :  { %409 = vsyncadd [#allocation4], 4294967040 }
 0x1cb   :  { %252 = vsyncpa [#allocation3], 1 }
 0x1cc   :  { %253 = vsyncpa [#allocation6], 1 }
 0x1cd   :  { %254 = vsyncpa [#allocation9], 1 }
 0x1ce   :  { %255 = vsyncpa [#allocation4], 1 }

</bundles_post_ra>
